<compile_context>
chip_gen: v7x
topology: tpu7x:2x2x1
jax: 0.10.0
libtpu: 0.0.40
codegen_flags: <defaults>
</compile_context>

<pallas_src>
import functools

import jax
import jax.numpy as jnp
from jax.experimental import pallas as pl
from jax.experimental.pallas import tpu as pltpu

D_IN = 256
D_HID = 128


def density_kernel(x_ref, w1_ref, b1_ref, w2_ref, b2_ref, o_ref, *, compute_dtype):
    # Layer 1: MXU matmul with f32 accumulation.  W1 arrives pre-cast to the
    # compute dtype (wrapper casts it once); x is only cast on load when its
    # storage dtype differs (the bandwidth win requires bf16 x already in HBM).
    x = x_ref[...]
    if x.dtype != compute_dtype:
        x = x.astype(compute_dtype)
    h = jnp.dot(x, w1_ref[...], preferred_element_type=jnp.float32)   # (tm, 128) f32
    h = jnp.maximum(h + b1_ref[...], 0.0)                             # f32 bias + ReLU

    # Layer 2: degenerate (tm,128)@(128,1) matmul on the MXU.  The MXU has big
    # slack while the kernel is x-DMA bound; keeping this off the VPU/XLU avoids
    # the lane reduction becoming the binding slot (v7x, and v6e with bf16 x).
    o = jnp.dot(h, w2_ref[...], preferred_element_type=jnp.float32)   # (tm, 1) f32
    o = o + b2_ref[0]                                                  # scalar bias (SMEM)
    o_ref[...] = jnp.maximum(o, 0.0).astype(o_ref.dtype)


@functools.partial(jax.jit, static_argnames=("tm", "compute_dtype"))
def _density_layer_impl(x, w1, b1, w2, b2, *, tm, compute_dtype):
    N, d_in = x.shape
    d_hid = w1.shape[1]
    assert d_in == D_IN and d_hid == D_HID and w2.shape == (d_hid, 1)
    assert tm % 128 == 0, "row tile should be a multiple of 128"

    # Shrink the tile for small N so (a) the grid keeps >= ~2 steps per
    # TensorCore (v7x has two) and (b) the ragged tail wastes few rows.
    min_steps = 4
    while tm > 128 and pl.cdiv(N, tm) < min_steps:
        tm //= 2

    n_tiles = pl.cdiv(N, tm)  # ragged last block: OOB rows discarded by Pallas

    w1_c = w1.astype(compute_dtype)                    # cast once, not per grid step
    b1_row = b1.reshape(1, d_hid).astype(jnp.float32)  # (1, 128)  resident VMEM row
    w2_col = w2.astype(jnp.float32)                    # (128, 1)  resident VMEM column
    b2_vec = b2.reshape(1).astype(jnp.float32)         # (1,)      scalar in SMEM

    # Only raise the scoped-VMEM limit when the double-buffered tiles would not
    # fit the smallest default (v5e: 16 MiB); cap from the actual chip so the
    # request can never exceed physical VMEM (v7x: 64 MiB per TensorCore).
    x_stream_bytes = 2 * tm * d_in * x.dtype.itemsize            # double-buffered x
    resident_bytes = 2 * d_in * d_hid * jnp.dtype(compute_dtype).itemsize
    out_bytes = 2 * tm * 1 * x.dtype.itemsize
    need = x_stream_bytes + resident_bytes + out_bytes + (1 << 20)
    vmem_limit = None
    if need > 12 * 1024 * 1024:
        try:
            cap = pltpu.get_tpu_info().vmem_capacity_bytes - (16 << 20)
        except Exception:  # pragma: no cover - conservative fallback
            cap = 48 << 20
        vmem_limit = int(min(max(need + (4 << 20), 16 << 20), cap))

    return pl.pallas_call(
        functools.partial(density_kernel, compute_dtype=compute_dtype),
        out_shape=jax.ShapeDtypeStruct((N, 1), x.dtype),
        grid_spec=pltpu.PrefetchScalarGridSpec(
            num_scalar_prefetch=0,
            grid=(n_tiles,),
            in_specs=[
                pl.BlockSpec((tm, d_in), lambda i: (i, 0)),          # x tile (streamed)
                pl.BlockSpec((d_in, d_hid), lambda i: (0, 0)),       # W1 (grid-invariant)
                pl.BlockSpec((1, d_hid), lambda i: (0, 0)),          # b1 row
                pl.BlockSpec((d_hid, 1), lambda i: (0, 0)),          # W2 column
                pl.BlockSpec(memory_space=pltpu.MemorySpace.SMEM),   # b2 scalar
            ],
            out_specs=pl.BlockSpec((tm, 1), lambda i: (i, 0)),
        ),
        compiler_params=pltpu.CompilerParams(
            dimension_semantics=("parallel",),
            vmem_limit_bytes=vmem_limit,
        ),
    )(x, w1_c, b1_row, w2_col, b2_vec)


def _pick_compute_dtype(x_dtype):
    """Default compute dtype: follow bf16 x; bf16 on v5e; else f32."""
    if x_dtype == jnp.bfloat16:
        return jnp.bfloat16
    try:
        kind = jax.devices()[0].device_kind.lower()
    except Exception:  # pragma: no cover
        kind = ""
    # v5e: f32 MXU passes are co-binding with the x DMA; bf16 operands restore
    # the mem-bound regime (f32 accumulation / bias / ReLU are kept).
    if "v5 lite" in kind or "v5e" in kind or "v5litepod" in kind:
        return jnp.bfloat16
    return jnp.float32


def density_layer(x, w1, b1, w2, b2, *, tm=2048, compute_dtype=None):
    if compute_dtype is None:
        compute_dtype = _pick_compute_dtype(x.dtype)
    return _density_layer_impl(x, w1, b1, w2, b2, tm=tm, compute_dtype=compute_dtype)


def init_params(key):
    """Deterministic init mimicking PyTorch nn.Linear (uniform +-1/sqrt(fan_in))."""
    k1, k2, k3, k4 = jax.random.split(key, 4)
    bound1 = 1.0 / jnp.sqrt(256.0)
    bound2 = 1.0 / jnp.sqrt(128.0)
    w1 = jax.random.uniform(k1, (256, 128), jnp.float32, -bound1, bound1)
    b1 = jax.random.uniform(k2, (128,), jnp.float32, -bound1, bound1)
    w2 = jax.random.uniform(k3, (128, 1), jnp.float32, -bound2, bound2)
    b2 = jax.random.uniform(k4, (1,), jnp.float32, -bound2, bound2)
    return w1, b1, w2, b2


def density_layer_ref(x, w1, b1, w2, b2):
    h = jnp.maximum(jnp.dot(x, w1, precision=jax.lax.Precision.HIGHEST) + b1, 0.0)
    return jnp.maximum(jnp.dot(h, w2, precision=jax.lax.Precision.HIGHEST) + b2, 0.0)


if __name__ == "__main__":
    key = jax.random.PRNGKey(0)
    k_params, k_x = jax.random.split(key)
    w1, b1, w2, b2 = init_params(k_params)

    # Deliberately NOT a multiple of the row tile: exercises the ragged last
    # block (no wrapper padding) and the tile-shrink heuristic (2048 -> 128).
    N = 300
    x = jax.random.normal(k_x, (N, 256), jnp.float32)

    ref = density_layer_ref(x, w1, b1, w2, b2)

    # Reference-matching path (f32 operands, f32 accumulation).
    out_f32 = jax.block_until_ready(
        density_layer(x, w1, b1, w2, b2, compute_dtype=jnp.float32)
    )
    assert out_f32.shape == (N, 1), out_f32.shape
    assert jnp.allclose(out_f32, ref, atol=1e-4, rtol=1e-4), "f32 path mismatch"

    # Bandwidth path from the perf review: x stored as bf16 in HBM (halves the
    # dominant DMA stream); bf16 matmul operands, f32 accumulation.  Relaxed
    # tolerance is expected and documented.
    x_bf16 = x.astype(jnp.bfloat16)
    out_bf16 = jax.block_until_ready(density_layer(x_bf16, w1, b1, w2, b2))
    assert out_bf16.shape == (N, 1), out_bf16.shape
    assert jnp.allclose(out_bf16.astype(jnp.float32), ref, atol=3e-2, rtol=3e-2), (
        "bf16 path mismatch"
    )

    print("KERNEL_OK")
</pallas_src>

<mosaic_0001>
module attributes {stable_mosaic.version = 11 : i64} {
  func.func @density_kernel(%arg0: i32, %arg1: memref<128x256xf32, #tpu.memory_space<vmem>>, %arg2: memref<256x128xf32, #tpu.memory_space<vmem>>, %arg3: memref<1x128xf32, #tpu.memory_space<vmem>>, %arg4: memref<128x1xf32, #tpu.memory_space<vmem>>, %arg5: memref<1xf32, #tpu.memory_space<smem>>, %arg6: memref<128x1xf32, #tpu.memory_space<vmem>>) attributes {dimension_semantics = [#tpu.dimension_semantics<parallel>], iteration_bounds = array<i64: 3>, scalar_prefetch = 0 : i64, scratch_operands = 0 : i64, tpu.core_type = #tpu.core_type<tc>, window_params = [{transform_indices = @transform_0, window_bounds = array<i64: 128, 256>}, {pipeline_mode = #tpu.pipeline_mode<synchronous>, transform_indices = @transform_1, window_bounds = array<i64: 256, 128>}, {pipeline_mode = #tpu.pipeline_mode<synchronous>, transform_indices = @transform_2, window_bounds = array<i64: 1, 128>}, {pipeline_mode = #tpu.pipeline_mode<synchronous>, transform_indices = @transform_3, window_bounds = array<i64: 128, 1>}, {transform_indices = @transform_4, window_bounds = array<i64: 1>}, {transform_indices = @transform_5, window_bounds = array<i64: 128, 1>}]} {
    %c0 = arith.constant 0 : index
    %c0_0 = arith.constant 0 : index
    %0 = vector.load %arg1[%c0, %c0_0] : memref<128x256xf32, #tpu.memory_space<vmem>>, vector<128x256xf32>
    %c0_1 = arith.constant 0 : index
    %c0_2 = arith.constant 0 : index
    %1 = vector.load %arg2[%c0_1, %c0_2] : memref<256x128xf32, #tpu.memory_space<vmem>>, vector<256x128xf32>
    %cst = arith.constant dense<0.000000e+00> : vector<128x128xf32>
    %2 = tpu.matmul %0, %1, %cst {dimension_numbers = #tpu.dot_dimension_numbers<[1], [0], [0], [1], [0, 0, 1, 1], [], []>} : vector<128x256xf32>, vector<256x128xf32>, vector<128x128xf32> -> vector<128x128xf32>
    %c0_3 = arith.constant 0 : index
    %c0_4 = arith.constant 0 : index
    %3 = vector.load %arg3[%c0_3, %c0_4] : memref<1x128xf32, #tpu.memory_space<vmem>>, vector<1x128xf32>
    %4 = vector.broadcast %3 : vector<1x128xf32> to vector<128x128xf32>
    %5 = arith.addf %2, %4 : vector<128x128xf32>
    %cst_5 = arith.constant 0.000000e+00 : f32
    %6 = vector.broadcast %cst_5 : f32 to vector<128x128xf32>
    %7 = arith.maximumf %5, %6 : vector<128x128xf32>
    %c0_6 = arith.constant 0 : index
    %c0_7 = arith.constant 0 : index
    %8 = vector.load %arg4[%c0_6, %c0_7] : memref<128x1xf32, #tpu.memory_space<vmem>>, vector<128x1xf32>
    %cst_8 = arith.constant dense<0.000000e+00> : vector<128x1xf32>
    %9 = tpu.matmul %7, %8, %cst_8 {dimension_numbers = #tpu.dot_dimension_numbers<[1], [0], [0], [1], [0, 0, 1, 1], [], []>} : vector<128x128xf32>, vector<128x1xf32>, vector<128x1xf32> -> vector<128x1xf32>
    %c0_9 = arith.constant 0 : index
    %10 = memref.load %arg5[%c0_9] : memref<1xf32, #tpu.memory_space<smem>>
    %11 = vector.broadcast %10 : f32 to vector<128x1xf32>
    %12 = arith.addf %9, %11 : vector<128x1xf32>
    %cst_10 = arith.constant 0.000000e+00 : f32
    %13 = vector.broadcast %cst_10 : f32 to vector<128x1xf32>
    %14 = arith.maximumf %12, %13 : vector<128x1xf32>
    %c0_11 = arith.constant 0 : index
    %c0_12 = arith.constant 0 : index
    %15 = vector.load %arg6[%c0_11, %c0_12] : memref<128x1xf32, #tpu.memory_space<vmem>>, vector<128x1xf32>
    tpu.vector_store %arg6[%c0_11, %c0_12], %14 {strides = array<i32>} : memref<128x1xf32, #tpu.memory_space<vmem>>, vector<128x1xf32>,
    return
  }
  func.func @transform_0(%arg0: i32) -> (i32, i32) {
    %c0_i32 = arith.constant 0 : i32
    %c0_i32_0 = arith.constant 0 : i32
    return %arg0, %c0_i32 : i32, i32
  }
  func.func @transform_1(%arg0: i32) -> (i32, i32) {
    %c0_i32 = arith.constant 0 : i32
    %c0_i32_0 = arith.constant 0 : i32
    %c0_i32_1 = arith.constant 0 : i32
    return %c0_i32, %c0_i32_0 : i32, i32
  }
  func.func @transform_2(%arg0: i32) -> (i32, i32) {
    %c0_i32 = arith.constant 0 : i32
    %c0_i32_0 = arith.constant 0 : i32
    %c0_i32_1 = arith.constant 0 : i32
    return %c0_i32, %c0_i32_0 : i32, i32
  }
  func.func @transform_3(%arg0: i32) -> (i32, i32) {
    %c0_i32 = arith.constant 0 : i32
    %c0_i32_0 = arith.constant 0 : i32
    %c0_i32_1 = arith.constant 0 : i32
    return %c0_i32, %c0_i32_0 : i32, i32
  }
  func.func @transform_4(%arg0: i32) -> i32 {
    %c0_i32 = arith.constant 0 : i32
    %c0_i32_0 = arith.constant 0 : i32
    return %c0_i32 : i32
  }
  func.func @transform_5(%arg0: i32) -> (i32, i32) {
    %c0_i32 = arith.constant 0 : i32
    %c0_i32_0 = arith.constant 0 : i32
    return %arg0, %c0_i32 : i32, i32
  }
}

</mosaic_0001>

<bundles_post_ra>
// kernel: _density_layer_impl.1
= control target key start
LH: loop header
LB: loop body
LE: loop exit
PB: predicated region body
PF: predicated region fallthrough
CT: control target
= control target key end

     0   :  { %s1981_s0 = inlined_call_operand.hbm [shape: f32[300,256], index: 0, kind: input, shape index: {}]   ;;  %s1982_s1 = inlined_call_operand.hbm [shape: f32[256,128], index: 1, kind: input, shape index: {}]   ;;  %s1983_s2 = inlined_call_operand.vmem [shape: f32[1,128], index: 2, kind: input, shape index: {}]   ;;  %s1984_s3 = inlined_call_operand.vmem [shape: f32[128,1], index: 3, kind: input, shape index: {}]   ;;  %s1985_s4 = inlined_call_operand.<no memory space> [shape: f32[1], index: 4, kind: input, shape index: {}]   ;;  %s1986_s5 = inlined_call_operand.vmem [shape: f32[300,1], index: 5, kind: output, shape index: {}]  }
   0x1   :  { %10 = sst [smem:[#allocation2]] %s1985_s4 }
   0x2   :  { %11 = vsyncpa [#allocation4], 0 }
   0x3   :  { %13 = vsyncpa [#allocation4 + $0x1], 0 }
   0x4   :  { %14 = vsyncpa [#allocation6], 0  ;;  %s1582_s20 = smov 0   ;;  %s1584_s21 = smov 0  }
   0x5   :  { %s1586_s22 = smov 0   ;;  %s1588_s23 = smov 0  }
   0x6 LB: > { %s1601_s4 = sadd.s32 4294967295, %s1509_s23   ;;  %s1604_s24 = sadd.s32 1, %s1509_s23   ;;  %s1509_s23 = sphi %s1588_s23, %s2007_s23   ;;  %s1505_s22 = sphi %s1586_s22, %s2006_s22   ;;  %s1501_s21 = sphi %s1584_s21, %s2005_s21   ;;  %s1497_s20 = sphi %s1582_s20, %s2004_s20  }
   0x7   : > { %s24_s25 = ssub.s32 %s1509_s23, %s1604_s24  ;;  %s27_s26 = sadd.s32 1, %s1505_s22 }
   0x8   : > { %p25_p0 = scmp.eq.s32.totalorder %s24_s25, 0  ;;  %p34_p1 = scmp.ne.s32.totalorder %s1505_s22, %s1501_s21 }
   0x9   : > { %p35_p2 = scmp.eq.s32.totalorder %s1509_s23, 0  ;;  %p40_p3 = scmp.ne.s32.totalorder %s1501_s21, %s1497_s20 }
   0xa   : > { %s1614_s27 = scalar_select %p25_p0, %s1505_s22, %s27_s26  }
   0xb   : > { %p1616_p4 = por %p35_p2, %p34_p1  ;;  %p1987_p5 = scmp.eq.s32.totalorder %s1601_s4, 0 }
   0xc   : > { %p148_p6 = scmp.eq.s32.totalorder %s1601_s4, 2  ;;  %p999_p7 = scmp.ge.s32.totalorder %s1509_s23, 1 }
   0xd   : > { %s1990_s28 = scalar_select %p1616_p4, 1, 0 }
   0xe   : > { %p1625_p8 = por %p1987_p5, %p40_p3  ;;  %p161_p9 = scmp.lt.s32.totalorder %s1509_s23, 4 }
   0xf   : > { %p1630_p10 = por %p148_p6, %p34_p1  ;;  %s1543_s7 = smov [#allocation5]  }
  0x10   : > { %s1991_s29 = scalar_select %p1625_p8, 1, 0 }
  0x11   : > { %s1992_s30 = scalar_select %p1630_p10, 1, 0 }
  0x12   : > { %p1634_p11 = pnand %p999_p7, %p161_p9  ;;  %s173_s8 = sshll.u32 %s1543_s7, 4  ;;  %s174_s8 = int_to_ptr.vmem [resolvable:$true] %s173_s8 }
  0x13   : > { %s1383_s12 = scalar_lea.hbm %s1982_s1, 4096 }
  0x14   : > { %s1993_s6 = scalar_select %p1634_p11, 1, 0 }
  0x15   : > { %p1276_p12 = pneg %p1634_p11  ;;  %p1384_p0 = scmp.ne.s32.totalorder %s1982_s1, %s1383_s12 }
  0x16   : > { %p1390_p6 = scmp.lt.u32.totalorder %s1383_s12, %s1982_s1 }
  0x17   : > { %p1642_p13 = pnand %p1276_p12, %p1987_p5 }
  0x19   : > { %p1385_p1 = pneg %p1642_p13 }
  0x1b   : > { %p1386_p2 = pnand %p1385_p1, %p1384_p0 }
  0x1d   : > { %p1387_p3 = pneg %p1386_p2 }
  0x1f   : > { %p1392_p7 = pnand %p1390_p6, %p1387_p3 }
  0x21   : > { %1395 = shalt.err (!%p1392_p7)
}
  0x22   : > { %s1396_s17 = scalar_lea.vmem %s174_s8, 4096  ;;  %p1404_p10 = scmp.lt.s32.totalorder %s174_s8, %s174_s8 }
  0x23   : > { %p1397_p9 = scmp.ne.s32.totalorder %s174_s8, %s1396_s17  ;;  %p1405_p8 = scmp.lt.s32.totalorder %s1396_s17, %s1396_s17 }
  0x25   : > { %p1399_p12 = pnand %p1397_p9, %p1385_p1  ;;  %p1406_p11 = por %p1405_p8, %p1404_p10 }
  0x27   : > { %p1400_p5 = pneg %p1399_p12 }
  0x29   : > { %p1407_p4 = pnand %p1406_p11, %p1400_p5 }
  0x2b   : > { %1410 = shalt.err (!%p1407_p4)
}
  0x2c   : > { %s1544_s18 = smov 128   ;;  %s1545_s19 = smov 8  }
  0x2d   : > { %1279 = dma.hbm_to_vmem [thread:$0]  (!%p1642_p13), %s1982_s1, 4096, %s174_s8, [#allocation6], %s1544_s18, %s1544_s18, %s1545_s19  }
  0x2e   : > { %p1001_p0 = scmp.ge.s32.totalorder %s1509_s23, 3 }
  0x2f   : > { %p1995_p2 = scmp.ne.s32.totalorder (!%p1001_p0), %s1990_s28, 0 }
  0x30   : > { %192 = sbr.rel (%p1001_p0) target bundleno = 90 (0x5a), region = 32 }
  0x37   : > { %195 = sbr.rel (!%p1995_p2) target bundleno = 90 (0x5a), region = 36  ;;  %s196_s26 = sand.u32 (%p1995_p2), 1, %s1505_s22  }
  0x38   : > { %s1003_s7 = sshll.u32 (%p1995_p2), %s1509_s23, 4  ;;  %s1002_s10 = sshll.u32 (%p1995_p2), %s196_s26, 8 }
  0x39   : > { %s202_s11 = ssub.s32 (%p1995_p2), 38, %s1003_s7  ;;  %s1670_s13 = scalar_lea.sflag (%p1995_p2), [#allocation4], %s196_s26 }
  0x3a   : > { %p203_p4 = scmp.lt.s32.totalorder (%p1995_p2), %s202_s11, 16  ;;  %s200_s8 = scalar_lea.vmem (%p1995_p2), [#allocation3], %s1002_s10 }
  0x3e   : > { %s2009_s11 = smov (!%p203_p4, %s202_s11), 16 }
  0x3f   : > { %s1667_s12 = sshll.u32 %s2009_s11, 8 }
  0x40   : > { %s208_s9 = ssub.s32 4096, %s1667_s12 }
  0x41   : > { %209 = vsyncadd %s1670_s13, %s208_s9  ;;  %p1006_p5 = scmp.ne.s32.totalorder %s1667_s12, 0  ;;  %s1035_s28 = sshll.u32 %s1509_s23, 12 }
  0x42   : > { %s1678_s16 = scalar_lea.hbm %s1981_s0, %s1035_s28  ;;  %s215_s17 = sshll.u32 %s200_s8, 4  ;;  %s1680_s17 = int_to_ptr.vmem [resolvable:$true] %s215_s17 }
  0x43   : > { %s1411_s18 = scalar_lea.hbm %s1678_s16, %s1667_s12  ;;  %s1415_s23 = scalar_lea.hbm %s1981_s0, 9728 }
  0x44   : > { %p1412_p8 = scmp.ne.s32.totalorder %s1678_s16, %s1411_s18  ;;  %p1416_p13 = scmp.lt.u32.totalorder %s1678_s16, %s1981_s0 }
  0x45   : > { %p1417_p1 = scmp.lt.u32.totalorder %s1415_s23, %s1411_s18  ;;  %p1419_p6 = scmp.lt.u32.totalorder %s1411_s18, %s1678_s16 }
  0x46   : > { %p1413_p10 = pnand %p1412_p8, %p1006_p5 }
  0x47   : > { %p1418_p3 = por %p1417_p1, %p1416_p13 }
  0x48   : > { %p1414_p11 = pneg %p1413_p10 }
  0x49   : > { %p1420_p7 = por %p1419_p6, %p1418_p3 }
  0x4b   : > { %p1421_p9 = pnand %p1420_p7, %p1414_p11 }
  0x4d   : > { %1424 = shalt.err (!%p1421_p9)
}
  0x4e   : > { %s1425_s7 = scalar_lea.vmem %s1680_s17, %s1667_s12  ;;  %s1546_s10 = smov [#allocation3]  }
  0x4f   : > { %p1426_p12 = scmp.ne.s32.totalorder %s1680_s17, %s1425_s7  ;;  %s1429_s11 = sshll.u32 %s1546_s10, 4  ;;  %s1430_s11 = int_to_ptr.vmem [resolvable:$false] %s1429_s11 }
  0x50   : > { %s1431_s9 = scalar_lea.vmem %s1430_s11, 8192  ;;  %p1432_p4 = scmp.lt.s32.totalorder %s1680_s17, %s1430_s11 }
  0x51   : > { %p1427_p0 = pnand %p1426_p12, %p1006_p5  ;;  %p1433_p8 = scmp.lt.s32.totalorder %s1431_s9, %s1425_s7 }
  0x53   : > { %p1428_p2 = pneg %p1427_p0  ;;  %p1434_p10 = por %p1433_p8, %p1432_p4 }
  0x55   : > { %p1435_p13 = pnand %p1434_p10, %p1428_p2 }
  0x57   : > { %1438 = shalt.err (!%p1435_p13)
}
  0x58   : > { %s1547_s8 = smov 256   ;;  %s1548_s28 = smov 16  }
  0x59   : > { %221 = dma.hbm_to_vmem [thread:$0]  (%p1006_p5), %s1678_s16, %s1667_s12, %s1680_s17, %s1670_s13, %s1547_s8, %s1547_s8, %s1548_s28  }
  0x5a PF: > { %p1996_p11 = scmp.ne.s32.totalorder %s1993_s6, 0 }
  0x5b   : > { %s1710_s14 = sand.u32 (!%p1996_p11), 1, %s1501_s21   ;;  %p1997_p1 = scmp.ne.s32.totalorder (!%p1996_p11), %s1991_s29, 0 }
  0x5c   : > { %227 = sbr.rel (%p1996_p11) target bundleno = 684 (0x2ac), region = 40  ;;  %s1012_s15 = sshll.u32 (!%p1996_p11), %s1710_s14, 8 }
  0x5d   : > { %s230_s18 = scalar_lea.sflag (!%p1996_p11), [#allocation4], %s1710_s14  ;;  %s1714_s19 = scalar_lea.vmem (!%p1996_p11), [#allocation3], %s1012_s15 }
  0x63   : > { %1488 = dma.done.wait (%p1997_p1), %s230_s18, 4096  }
  0x64   : > { %1490 = vsyncadd (%p1997_p1), %s230_s18, 4294963200  ;;  %p1998_p5 = scmp.eq.s32.totalorder %s1601_s4, 0 }
  0x66   : > { %1492 = dma.done.wait (%p1998_p5), [#allocation6], 4096   ;;  %p1999_p3 = pmov %p1998_p5 }
  0x67   : > { %v322_v0 = vld [vmem:[#allocation5 + $0x80] sm:$0xff]  ;;  %v323_v1 = vld [vmem:[#allocation5 + $0x88] sm:$0xff]  ;;  %v324_v5 = vld [vmem:[#allocation5 + $0x90] sm:$0xff]  ;;  %s522_s28 = sld [smem:[#allocation2]]  ;;  %s1014_s15 = sshll.u32 %s1710_s14, 7  ;;  %vm685_vm0 = vcmask 7168  }
  0x68   : > { %1494 = vsyncadd (%p1999_p3), [#allocation6], 4294963200  ;;  %v306_v2 = vld [vmem:[#allocation5] sm:$0xff]  ;;  %v1207_v3 = vpack.c.bf16 %v323_v1, %v322_v0  ;;  %v307_v4 = vld [vmem:[#allocation5 + $0x8] sm:$0xff]  ;;  %s1830_s18 = scalar_lea.vmem [#allocation7], %s1014_s15   ;;  %p2000_p6 = scmp.ne.s32.totalorder %s1992_s30, 0 }
  0x69   : > { %v325_v6 = vld [vmem:[#allocation5 + $0x98] sm:$0xff]  ;;  %v1209_v7 = vpack.c.bf16 %v307_v4, %v306_v2  ;;  %v308_v9 = vld [vmem:[#allocation5 + $0x10] sm:$0xff]  ;;  %v326_v11 = vld [vmem:[#allocation5 + $0xa0] sm:$0xff]  ;;  %s1017_s14 = sshll.u32 (%p2000_p6), %s1601_s4, 4  ;;  %s1036_s29 = sshll.u32 (%p2000_p6), %s1601_s4, 7 }
  0x6a   : > { %v1211_v8 = vpack.c.bf16 %v325_v6, %v324_v5  ;;  %v309_v10 = vld [vmem:[#allocation5 + $0x18] sm:$0xff]  ;;  %1208 = vmatprep.subr.bf16.mxu0 %v1207_v3  ;;  %v327_v12 = vld [vmem:[#allocation5 + $0xa8] sm:$0xff]  ;;  %v310_v15 = vld [vmem:[#allocation5 + $0x20] sm:$0xff]  ;;  %s710_s6 = ssub.s32 (%p2000_p6), 38, %s1017_s14  ;;  %s1885_s16 = scalar_lea.vmem (%p2000_p6), %s1986_s5, %s1036_s29  }
  0x6b   : > { %1210 = vmatpush3.bf16.msra.mxu0 %v1209_v7  ;;  %v1213_v13 = vpack.c.bf16 %v309_v10, %v308_v9  ;;  %v1215_v14 = vpack.c.bf16 %v327_v12, %v326_v11  ;;  %v311_v16 = vld [vmem:[#allocation5 + $0x28] sm:$0xff]  ;;  %v328_v17 = vld [vmem:[#allocation5 + $0xb0] sm:$0xff]  ;;  %v329_v18 = vld [vmem:[#allocation5 + $0xb8] sm:$0xff]  ;;  %p711_p7 = scmp.lt.s32.totalorder (%p2000_p6), %s710_s6, 16 }
  0x6c   : > { %1212 = vmatprep.subr.bf16.mxu0 %v1211_v8  ;;  %v1217_v19 = vpack.c.bf16 %v311_v16, %v310_v15  ;;  %v1219_v20 = vpack.c.bf16 %v329_v18, %v328_v17  ;;  %v312_v21 = vld [vmem:[#allocation5 + $0x30] sm:$0xff]  ;;  %v313_v22 = vld [vmem:[#allocation5 + $0x38] sm:$0xff]  ;;  %v330_v23 = vld [vmem:[#allocation5 + $0xc0] sm:$0xff] }
  0x6d   : > { %v331_v24 = vld [vmem:[#allocation5 + $0xc8] sm:$0xff]  ;;  %v1221_v26 = vpack.c.bf16 %v313_v22, %v312_v21  ;;  %v314_v28 = vld [vmem:[#allocation5 + $0x40] sm:$0xff]  ;;  %v332_v30 = vld [vmem:[#allocation5 + $0xd0] sm:$0xff] }
  0x6e   : > { %v275_v25 = vld [vmem:[%s1714_s19 + $0x8] sm:$0xff]  ;;  %v1223_v27 = vpack.c.bf16 %v331_v24, %v330_v23  ;;  %v333_v31 = vld [vmem:[#allocation5 + $0xd8] sm:$0xff]  ;;  %v316_v34 = vld [vmem:[#allocation5 + $0x50] sm:$0xff] }
  0x6f   : > { %1214 = vmatpush3.bf16.msra.mxu0 %v1213_v13  ;;  %409 = vmatprep.mubr.f32.mxu0 %v275_v25  ;;  %v315_v29 = vld [vmem:[#allocation5 + $0x48] sm:$0xff]  ;;  %v1227_v33 = vpack.c.bf16 %v333_v31, %v332_v30  ;;  %v317_v35 = vld [vmem:[#allocation5 + $0x58] sm:$0xff]  ;;  %v334_v36 = vld [vmem:[#allocation5 + $0xe0] sm:$0xff] }
  0x70   : > { %1216 = vmatprep.subr.bf16.mxu0 %v1215_v14  ;;  %v1225_v32 = vpack.c.bf16 %v315_v29, %v314_v28  ;;  %v335_v37 = vld [vmem:[#allocation5 + $0xe8] sm:$0xff]  ;;  %v1229_v38 = vpack.c.bf16 %v317_v35, %v316_v34  ;;  %v318_v39 = vld [vmem:[#allocation5 + $0x60] sm:$0xff]  ;;  %v336_v42 = vld [vmem:[#allocation5 + $0xf0] sm:$0xff] }
  0x71   : > { %v319_v40 = vld [vmem:[#allocation5 + $0x68] sm:$0xff]  ;;  %v1231_v41 = vpack.c.bf16 %v335_v37, %v334_v36  ;;  %v506_v43 = vld [vmem:[%s1984_s3] sm:$0xff]  ;;  %v337_v45 = vld [vmem:[#allocation5 + $0xf8] sm:$0xff] }
  0x72   : > { %v507_v44 = vld [vmem:[%s1984_s3 + $0x8] sm:$0xff]  ;;  %v508_v47 = vld [vmem:[%s1984_s3 + $0x10] sm:$0xff]  ;;  %v509_v48 = vld [vmem:[%s1984_s3 + $0x18] sm:$0xff]  ;;  %v1233_v52 = vpack.c.bf16 %v319_v40, %v318_v39  ;;  %v1235_v53 = vpack.c.bf16 %v337_v45, %v336_v42 }
  0x73   : > { %1218 = vmatpush3.bf16.msra.mxu0 %v1217_v19  ;;  %v1239_v46 = vpack.c.bf16 %v507_v44, %v506_v43  ;;  %v1243_v49 = vpack.c.bf16 %v509_v48, %v508_v47  ;;  %v510_v50 = vld [vmem:[%s1984_s3 + $0x20] sm:$0xff]  ;;  %v511_v51 = vld [vmem:[%s1984_s3 + $0x28] sm:$0xff]  ;;  %v320_v54 = vld [vmem:[#allocation5 + $0x70] sm:$0xff] }
  0x74   : > { %1220 = vmatprep.subr.bf16.mxu0 %v1219_v20  ;;  %v321_v55 = vld [vmem:[#allocation5 + $0x78] sm:$0xff]  ;;  %v1247_v56 = vpack.c.bf16 %v511_v51, %v510_v50  ;;  %v512_v57 = vld [vmem:[%s1984_s3 + $0x30] sm:$0xff]  ;;  %v514_v61 = vld [vmem:[%s1984_s3 + $0x40] sm:$0xff] }
  0x75   : > { %1240 = vmatprep.subr.bf16.mxu1 %v1239_v46  ;;  %v513_v58 = vld [vmem:[%s1984_s3 + $0x38] sm:$0xff]  ;;  %v1237_v59 = vpack.c.bf16 %v321_v55, %v320_v54  ;;  %v515_v62 = vld [vmem:[%s1984_s3 + $0x48] sm:$0xff]  ;;  %v274_v63 = vld [vmem:[%s1714_s19] sm:$0xff] }
  0x76   : > { %1242 = vmatpush3.bf16.msra.mxu1 %v1239_v46  ;;  %v1251_v60 = vpack.c.bf16 %v513_v58, %v512_v57  ;;  %v277_v0 = vld [vmem:[%s1714_s19 + $0x18] sm:$0xff]  ;;  %v1255_v1 = vpack.c.bf16 %v515_v62, %v514_v61  ;;  %v276_v2 = vld [vmem:[%s1714_s19 + $0x10] sm:$0xff]  ;;  %v279_v3 = vld [vmem:[%s1714_s19 + $0x28] sm:$0xff] }
  0x77   : > { %1222 = vmatpush3.bf16.msra.mxu0 %v1221_v26  ;;  %1244 = vmatprep.subr.bf16.mxu1 %v1243_v49  ;;  %v278_v4 = vld [vmem:[%s1714_s19 + $0x20] sm:$0xff]  ;;  %v281_v5 = vld [vmem:[%s1714_s19 + $0x38] sm:$0xff]  ;;  %v280_v6 = vld [vmem:[%s1714_s19 + $0x30] sm:$0xff] }
  0x78   : > { %1224 = vmatprep.subr.bf16.mxu0 %v1223_v27  ;;  %v283_v7 = vld [vmem:[%s1714_s19 + $0x48] sm:$0xff]  ;;  %v282_v8 = vld [vmem:[%s1714_s19 + $0x40] sm:$0xff]  ;;  %v285_v9 = vld [vmem:[%s1714_s19 + $0x58] sm:$0xff] }
  0x79   : > { %v284_v10 = vld [vmem:[%s1714_s19 + $0x50] sm:$0xff]  ;;  %v287_v11 = vld [vmem:[%s1714_s19 + $0x68] sm:$0xff]  ;;  %v286_v12 = vld [vmem:[%s1714_s19 + $0x60] sm:$0xff] }
  0x7a   : > { %1246 = vmatpush3.bf16.msra.mxu1 %v1243_v49  ;;  %v289_v13 = vld [vmem:[%s1714_s19 + $0x78] sm:$0xff]  ;;  %v288_v14 = vld [vmem:[%s1714_s19 + $0x70] sm:$0xff]  ;;  %v291_v15 = vld [vmem:[%s1714_s19 + $0x88] sm:$0xff] }
  0x7b   : > { %1226 = vmatpush3.bf16.msra.mxu0 %v1225_v32  ;;  %1248 = vmatprep.subr.bf16.mxu1 %v1247_v56  ;;  %v290_v16 = vld [vmem:[%s1714_s19 + $0x80] sm:$0xff]  ;;  %v293_v17 = vld [vmem:[%s1714_s19 + $0x98] sm:$0xff]  ;;  %v292_v18 = vld [vmem:[%s1714_s19 + $0x90] sm:$0xff] }
  0x7c   : > { %1228 = vmatprep.subr.bf16.mxu0 %v1227_v33  ;;  %v295_v19 = vld [vmem:[%s1714_s19 + $0xa8] sm:$0xff]  ;;  %v294_v20 = vld [vmem:[%s1714_s19 + $0xa0] sm:$0xff]  ;;  %v297_v21 = vld [vmem:[%s1714_s19 + $0xb8] sm:$0xff] }
  0x7d   : > { %v296_v22 = vld [vmem:[%s1714_s19 + $0xb0] sm:$0xff]  ;;  %v299_v23 = vld [vmem:[%s1714_s19 + $0xc8] sm:$0xff]  ;;  %v298_v24 = vld [vmem:[%s1714_s19 + $0xc0] sm:$0xff] }
  0x7e   : > { %1250 = vmatpush3.bf16.msra.mxu1 %v1247_v56  ;;  %v301_v25 = vld [vmem:[%s1714_s19 + $0xd8] sm:$0xff]  ;;  %v300_v26 = vld [vmem:[%s1714_s19 + $0xd0] sm:$0xff]  ;;  %v303_v27 = vld [vmem:[%s1714_s19 + $0xe8] sm:$0xff] }
  0x7f   : > { %1230 = vmatpush3.bf16.msra.mxu0 %v1229_v38  ;;  %1252 = vmatprep.subr.bf16.mxu1 %v1251_v60  ;;  %v302_v28 = vld [vmem:[%s1714_s19 + $0xe0] sm:$0xff]  ;;  %v305_v29 = vld [vmem:[%s1714_s19 + $0xf8] sm:$0xff]  ;;  %v304_v30 = vld [vmem:[%s1714_s19 + $0xf0] sm:$0xff] }
  0x80   : > { %1232 = vmatprep.subr.bf16.mxu0 %v1231_v41  ;;  %v516_v31 = vld [vmem:[%s1984_s3 + $0x50] sm:$0xff]  ;;  %v517_v32 = vld [vmem:[%s1984_s3 + $0x58] sm:$0xff]  ;;  %v518_v34 = vld [vmem:[%s1984_s3 + $0x60] sm:$0xff] }
  0x81   : > { %v1259_v33 = vpack.c.bf16 %v517_v32, %v516_v31  ;;  %v519_v35 = vld [vmem:[%s1984_s3 + $0x68] sm:$0xff]  ;;  %v520_v37 = vld [vmem:[%s1984_s3 + $0x70] sm:$0xff]  ;;  %v521_v38 = vld [vmem:[%s1984_s3 + $0x78] sm:$0xff] }
  0x82   : > { %1254 = vmatpush3.bf16.msra.mxu1 %v1251_v60  ;;  %v1263_v36 = vpack.c.bf16 %v519_v35, %v518_v34  ;;  %v1267_v39 = vpack.c.bf16 %v521_v38, %v520_v37  ;;  %v1807_v42 = vld [vmem:[%s1983_s2] ss:$0 sm:$0xff] }
  0x83   : > { %1234 = vmatpush3.bf16.msra.mxu0 %v1233_v52  ;;  %1256 = vmatprep.subr.bf16.mxu1 %v1255_v1 }
  0x84   : > { %1236 = vmatprep.subr.bf16.mxu0 %v1235_v53 }
  0x86   : > { %1258 = vmatpush3.bf16.msra.mxu1 %v1255_v1 }
  0x87   : > { %1238 = vmatpush3.bf16.msra.mxu0 %v1237_v59  ;;  %1260 = vmatprep.subr.bf16.mxu1 %v1259_v33 }
  0x8a   : > { %410 = vmatmul.mubr.f32.vlgmr.msra.gmra.mrb[0].mxu0 %v274_v63  ;;  %1262 = vmatpush3.bf16.msra.mxu1 %v1259_v33 }
  0x8b   : > { %414 = vmatprep.mubr.f32.mxu0 %v277_v0  ;;  %1264 = vmatprep.subr.bf16.mxu1 %v1263_v36 }
  0x8e   : > { %415 = vmatmul.mubr.f32.gmra.mrb[2].mxu0 %v276_v2  ;;  %1266 = vmatpush3.bf16.msra.mxu1 %v1263_v36 }
  0x8f   : > { %419 = vmatprep.mubr.f32.mxu0 %v279_v3  ;;  %1268 = vmatprep.subr.bf16.mxu1 %v1267_v39 }
  0x92   : > { %420 = vmatmul.mubr.f32.gmra.mrb[4].mxu0 %v278_v4  ;;  %1270 = vmatpush3.bf16.msra.mxu1 %v1267_v39 }
  0x93   : > { %424 = vmatprep.mubr.f32.mxu0 %v281_v5 }
  0x96   : > { %425 = vmatmul.mubr.f32.gmra.mrb[6].mxu0 %v280_v6 }
  0x97   : > { %429 = vmatprep.mubr.f32.mxu0 %v283_v7 }
  0x9a   : > { %430 = vmatmul.mubr.f32.gmra.mrb[8].mxu0 %v282_v8 }
  0x9b   : > { %434 = vmatprep.mubr.f32.mxu0 %v285_v9 }
  0x9e   : > { %435 = vmatmul.mubr.f32.gmra.mrb[10].mxu0 %v284_v10 }
  0x9f   : > { %439 = vmatprep.mubr.f32.mxu0 %v287_v11 }
  0xa2   : > { %440 = vmatmul.mubr.f32.gmra.mrb[12].mxu0 %v286_v12 }
  0xa3   : > { %444 = vmatprep.mubr.f32.mxu0 %v289_v13 }
  0xa6   : > { %445 = vmatmul.mubr.f32.gmra.mrb[14].mxu0 %v288_v14 }
  0xa7   : > { %449 = vmatprep.mubr.f32.mxu0 %v291_v15 }
  0xaa   : > { %450 = vmatmul.mubr.f32.gmra.mrb[16].mxu0 %v290_v16 }
  0xab   : > { %454 = vmatprep.mubr.f32.mxu0 %v293_v17 }
  0xae   : > { %455 = vmatmul.mubr.f32.gmra.mrb[18].mxu0 %v292_v18 }
  0xaf   : > { %459 = vmatprep.mubr.f32.mxu0 %v295_v19 }
  0xb2   : > { %460 = vmatmul.mubr.f32.gmra.mrb[20].mxu0 %v294_v20 }
  0xb3   : > { %464 = vmatprep.mubr.f32.mxu0 %v297_v21 }
  0xb6   : > { %465 = vmatmul.mubr.f32.gmra.mrb[22].mxu0 %v296_v22 }
  0xb7   : > { %469 = vmatprep.mubr.f32.mxu0 %v299_v23 }
  0xba   : > { %470 = vmatmul.mubr.f32.gmra.mrb[24].mxu0 %v298_v24 }
  0xbb   : > { %474 = vmatprep.mubr.f32.mxu0 %v301_v25 }
  0xbe   : > { %475 = vmatmul.mubr.f32.gmra.mrb[26].mxu0 %v300_v26 }
  0xbf   : > { %479 = vmatprep.mubr.f32.mxu0 %v303_v27 }
  0xc2   : > { %480 = vmatmul.mubr.f32.gmra.mrb[28].mxu0 %v302_v28 }
  0xc3   : > { %484 = vmatprep.mubr.f32.mxu0 %v305_v29 }
  0xc6   : > { %485 = vmatmul.mubr.f32.gmra.mrb[30].mxu0 %v304_v30 }
 0x15d   : > { %v1071_v40 = vpop.f32.mrb[0].mxu0 }
 0x15e   : > { %v1072_v41 = vpop.f32.mrb[1].mxu0 }
 0x15f   : > { %v1073_v43 = vadd.f32 %v1072_v41, %v1071_v40 }
 0x161   : > { %v1074_v44 = vpop.f32.mrb[2].mxu0  ;;  %v412_v45 = vadd.f32 %v1073_v43, %v1807_v42 }
 0x162   : > { %v1075_v46 = vpop.f32.mrb[3].mxu0 }
 0x163   : > { %v1076_v47 = vadd.f32 %v1075_v46, %v1074_v44  ;;  %v490_v48 = vmax.f32 %v412_v45, 0.0 }
 0x165   : > { %v417_v49 = vadd.f32 %v1076_v47, %v1807_v42  ;;  %v1077_v50 = vpop.f32.mrb[4].mxu0  ;;  %1183 = vmatprep.mubr.f32.mxu1 %v490_v48 }
 0x166   : > { %v1078_v51 = vpop.f32.mrb[5].mxu0 }
 0x167   : > { %v491_v52 = vmax.f32 %v417_v49, 0.0  ;;  %v1079_v53 = vadd.f32 %v1078_v51, %v1077_v50 }
 0x169   : > { %v422_v54 = vadd.f32 %v1079_v53, %v1807_v42  ;;  %v1080_v55 = vpop.f32.mrb[6].mxu0  ;;  %1184 = vmatmul.mubr.f32.vlgmr.msra.gmra.mrb[0].mxu1 %v491_v52 }
 0x16a   : > { %v1081_v56 = vpop.f32.mrb[7].mxu0 }
 0x16b   : > { %v492_v57 = vmax.f32 %v422_v54, 0.0  ;;  %v1082_v58 = vadd.f32 %v1081_v56, %v1080_v55 }
 0x16d   : > { %v427_v59 = vadd.f32 %v1082_v58, %v1807_v42  ;;  %v1083_v60 = vpop.f32.mrb[8].mxu0  ;;  %1186 = vmatprep.mubr.f32.mxu1 %v492_v57  ;;  %v1825_v58 = vstv %s522_s28 }
 0x16e   : > { %v1084_v61 = vpop.f32.mrb[9].mxu0 }
 0x16f   : > { %v493_v62 = vmax.f32 %v427_v59, 0.0  ;;  %v1085_v63 = vadd.f32 %v1084_v61, %v1083_v60 }
 0x171   : > { %v432_v0 = vadd.f32 %v1085_v63, %v1807_v42  ;;  %v1086_v1 = vpop.f32.mrb[10].mxu0  ;;  %1187 = vmatmul.mubr.f32.gmra.mrb[2].mxu1 %v493_v62 }
 0x172   : > { %v1087_v2 = vpop.f32.mrb[11].mxu0 }
 0x173   : > { %v494_v3 = vmax.f32 %v432_v0, 0.0  ;;  %v1088_v4 = vadd.f32 %v1087_v2, %v1086_v1 }
 0x175   : > { %v437_v5 = vadd.f32 %v1088_v4, %v1807_v42  ;;  %v1089_v6 = vpop.f32.mrb[12].mxu0  ;;  %1189 = vmatprep.mubr.f32.mxu1 %v494_v3 }
 0x176   : > { %v1090_v7 = vpop.f32.mrb[13].mxu0 }
 0x177   : > { %v495_v8 = vmax.f32 %v437_v5, 0.0  ;;  %v1091_v9 = vadd.f32 %v1090_v7, %v1089_v6 }
 0x179   : > { %v442_v10 = vadd.f32 %v1091_v9, %v1807_v42  ;;  %v1092_v11 = vpop.f32.mrb[14].mxu0  ;;  %1190 = vmatmul.mubr.f32.gmra.mrb[4].mxu1 %v495_v8 }
 0x17a   : > { %v1093_v12 = vpop.f32.mrb[15].mxu0 }
 0x17b   : > { %v496_v13 = vmax.f32 %v442_v10, 0.0  ;;  %v1094_v14 = vadd.f32 %v1093_v12, %v1092_v11 }
 0x17d   : > { %v447_v15 = vadd.f32 %v1094_v14, %v1807_v42  ;;  %v1095_v16 = vpop.f32.mrb[16].mxu0  ;;  %1192 = vmatprep.mubr.f32.mxu1 %v496_v13 }
 0x17e   : > { %v1096_v17 = vpop.f32.mrb[17].mxu0 }
 0x17f   : > { %v497_v18 = vmax.f32 %v447_v15, 0.0  ;;  %v1097_v19 = vadd.f32 %v1096_v17, %v1095_v16 }
 0x181   : > { %v452_v20 = vadd.f32 %v1097_v19, %v1807_v42  ;;  %v1098_v21 = vpop.f32.mrb[18].mxu0  ;;  %1193 = vmatmul.mubr.f32.gmra.mrb[6].mxu1 %v497_v18 }
 0x182   : > { %v1099_v22 = vpop.f32.mrb[19].mxu0 }
 0x183   : > { %v498_v23 = vmax.f32 %v452_v20, 0.0  ;;  %v1100_v24 = vadd.f32 %v1099_v22, %v1098_v21 }
 0x185   : > { %v457_v25 = vadd.f32 %v1100_v24, %v1807_v42  ;;  %v1101_v26 = vpop.f32.mrb[20].mxu0  ;;  %1195 = vmatprep.mubr.f32.mxu1 %v498_v23 }
 0x186   : > { %v1102_v27 = vpop.f32.mrb[21].mxu0 }
 0x187   : > { %v499_v28 = vmax.f32 %v457_v25, 0.0  ;;  %v1103_v29 = vadd.f32 %v1102_v27, %v1101_v26 }
 0x189   : > { %v462_v30 = vadd.f32 %v1103_v29, %v1807_v42  ;;  %v1104_v31 = vpop.f32.mrb[22].mxu0  ;;  %1196 = vmatmul.mubr.f32.gmra.mrb[8].mxu1 %v499_v28 }
 0x18a   : > { %v1105_v32 = vpop.f32.mrb[23].mxu0 }
 0x18b   : > { %v500_v33 = vmax.f32 %v462_v30, 0.0  ;;  %v1106_v34 = vadd.f32 %v1105_v32, %v1104_v31 }
 0x18d   : > { %v467_v35 = vadd.f32 %v1106_v34, %v1807_v42  ;;  %v1107_v36 = vpop.f32.mrb[24].mxu0  ;;  %1198 = vmatprep.mubr.f32.mxu1 %v500_v33 }
 0x18e   : > { %v1108_v37 = vpop.f32.mrb[25].mxu0 }
 0x18f   : > { %v501_v38 = vmax.f32 %v467_v35, 0.0  ;;  %v1109_v39 = vadd.f32 %v1108_v37, %v1107_v36 }
 0x191   : > { %v472_v40 = vadd.f32 %v1109_v39, %v1807_v42  ;;  %v1110_v41 = vpop.f32.mrb[26].mxu0  ;;  %1199 = vmatmul.mubr.f32.gmra.mrb[10].mxu1 %v501_v38 }
 0x192   : > { %v1111_v43 = vpop.f32.mrb[27].mxu0 }
 0x193   : > { %v502_v44 = vmax.f32 %v472_v40, 0.0  ;;  %v1112_v45 = vadd.f32 %v1111_v43, %v1110_v41 }
 0x195   : > { %v477_v46 = vadd.f32 %v1112_v45, %v1807_v42  ;;  %v1113_v47 = vpop.f32.mrb[28].mxu0  ;;  %1201 = vmatprep.mubr.f32.mxu1 %v502_v44 }
 0x196   : > { %v1114_v48 = vpop.f32.mrb[29].mxu0 }
 0x197   : > { %v503_v49 = vmax.f32 %v477_v46, 0.0  ;;  %v1115_v50 = vadd.f32 %v1114_v48, %v1113_v47 }
 0x199   : > { %v482_v51 = vadd.f32 %v1115_v50, %v1807_v42  ;;  %v1116_v52 = vpop.f32.mrb[30].mxu0  ;;  %1202 = vmatmul.mubr.f32.gmra.mrb[12].mxu1 %v503_v49 }
 0x19a   : > { %v1117_v53 = vpop.f32.mrb[31].mxu0 }
 0x19b   : > { %v504_v54 = vmax.f32 %v482_v51, 0.0  ;;  %v1118_v55 = vadd.f32 %v1117_v53, %v1116_v52 }
 0x19d   : > { %v487_v56 = vadd.f32 %v1118_v55, %v1807_v42  ;;  %1204 = vmatprep.mubr.f32.mxu1 %v504_v54 }
 0x19f   : > { %v505_v57 = vmax.f32 %v487_v56, 0.0 }
 0x1a1   : > { %1205 = vmatmul.mubr.f32.gmra.mrb[14].mxu1 %v505_v57 }
 0x23c   : > { %v1185_v59 = vpop.f32.mrb[0].mxu1 }
 0x23d   : > { %v596_v60 = vadd.f32 %v1185_v59, %v1825_v58  ;;  %v590_v61 = vpop.f32.mrb[1].mxu1 }
 0x23e   : > { %v591_v62 = vadd.f32 %v590_v61, %v1825_v58 }
 0x23f   : > { %v670_v63 = vmax.f32 %v596_v60, 0.0 }
 0x240   : > { %v669_v0 = vmax.f32 %v591_v62, 0.0 }
 0x241   : > { %687 = vst.msk [vmem:[%s1830_s18 + $0x8] sm:$0xff] %vm685_vm0, %v670_v63 }
 0x242   : > { %686 = vst.msk [vmem:[%s1830_s18] sm:$0xff] %vm685_vm0, %v669_v0 }
 0x244   : > { %v1188_v42 = vpop.f32.mrb[2].mxu1 }
 0x245   : > { %v606_v1 = vadd.f32 %v1188_v42, %v1825_v58  ;;  %v600_v2 = vpop.f32.mrb[3].mxu1 }
 0x246   : > { %v601_v3 = vadd.f32 %v600_v2, %v1825_v58 }
 0x247   : > { %v672_v4 = vmax.f32 %v606_v1, 0.0 }
 0x248   : > { %v671_v5 = vmax.f32 %v601_v3, 0.0 }
 0x249   : > { %689 = vst.msk [vmem:[%s1830_s18 + $0x18] sm:$0xff] %vm685_vm0, %v672_v4 }
 0x24a   : > { %688 = vst.msk [vmem:[%s1830_s18 + $0x10] sm:$0xff] %vm685_vm0, %v671_v5 }
 0x24c   : > { %v1191_v6 = vpop.f32.mrb[4].mxu1 }
 0x24d   : > { %v616_v7 = vadd.f32 %v1191_v6, %v1825_v58  ;;  %v610_v8 = vpop.f32.mrb[5].mxu1 }
 0x24e   : > { %v611_v9 = vadd.f32 %v610_v8, %v1825_v58 }
 0x24f   : > { %v674_v10 = vmax.f32 %v616_v7, 0.0 }
 0x250   : > { %v673_v11 = vmax.f32 %v611_v9, 0.0 }
 0x251   : > { %691 = vst.msk [vmem:[%s1830_s18 + $0x28] sm:$0xff] %vm685_vm0, %v674_v10 }
 0x252   : > { %690 = vst.msk [vmem:[%s1830_s18 + $0x20] sm:$0xff] %vm685_vm0, %v673_v11 }
 0x254   : > { %v1194_v12 = vpop.f32.mrb[6].mxu1 }
 0x255   : > { %v626_v13 = vadd.f32 %v1194_v12, %v1825_v58  ;;  %v620_v14 = vpop.f32.mrb[7].mxu1 }
 0x256   : > { %v621_v15 = vadd.f32 %v620_v14, %v1825_v58 }
 0x257   : > { %v676_v16 = vmax.f32 %v626_v13, 0.0 }
 0x258   : > { %v675_v17 = vmax.f32 %v621_v15, 0.0 }
 0x259   : > { %693 = vst.msk [vmem:[%s1830_s18 + $0x38] sm:$0xff] %vm685_vm0, %v676_v16 }
 0x25a   : > { %692 = vst.msk [vmem:[%s1830_s18 + $0x30] sm:$0xff] %vm685_vm0, %v675_v17 }
 0x25c   : > { %v1197_v18 = vpop.f32.mrb[8].mxu1 }
 0x25d   : > { %v636_v19 = vadd.f32 %v1197_v18, %v1825_v58  ;;  %v630_v20 = vpop.f32.mrb[9].mxu1 }
 0x25e   : > { %v631_v21 = vadd.f32 %v630_v20, %v1825_v58 }
 0x25f   : > { %v678_v22 = vmax.f32 %v636_v19, 0.0 }
 0x260   : > { %v677_v23 = vmax.f32 %v631_v21, 0.0 }
 0x261   : > { %695 = vst.msk [vmem:[%s1830_s18 + $0x48] sm:$0xff] %vm685_vm0, %v678_v22 }
 0x262   : > { %694 = vst.msk [vmem:[%s1830_s18 + $0x40] sm:$0xff] %vm685_vm0, %v677_v23 }
 0x264   : > { %v1200_v24 = vpop.f32.mrb[10].mxu1 }
 0x265   : > { %v646_v25 = vadd.f32 %v1200_v24, %v1825_v58  ;;  %v640_v26 = vpop.f32.mrb[11].mxu1 }
 0x266   : > { %v641_v27 = vadd.f32 %v640_v26, %v1825_v58 }
 0x267   : > { %v680_v28 = vmax.f32 %v646_v25, 0.0 }
 0x268   : > { %v679_v29 = vmax.f32 %v641_v27, 0.0 }
 0x269   : > { %697 = vst.msk [vmem:[%s1830_s18 + $0x58] sm:$0xff] %vm685_vm0, %v680_v28 }
 0x26a   : > { %696 = vst.msk [vmem:[%s1830_s18 + $0x50] sm:$0xff] %vm685_vm0, %v679_v29 }
 0x26c   : > { %v1203_v30 = vpop.f32.mrb[12].mxu1 }
 0x26d   : > { %v656_v31 = vadd.f32 %v1203_v30, %v1825_v58  ;;  %v650_v32 = vpop.f32.mrb[13].mxu1 }
 0x26e   : > { %v651_v33 = vadd.f32 %v650_v32, %v1825_v58 }
 0x26f   : > { %v682_v34 = vmax.f32 %v656_v31, 0.0 }
 0x270   : > { %v681_v35 = vmax.f32 %v651_v33, 0.0 }
 0x271   : > { %699 = vst.msk [vmem:[%s1830_s18 + $0x68] sm:$0xff] %vm685_vm0, %v682_v34 }
 0x272   : > { %698 = vst.msk [vmem:[%s1830_s18 + $0x60] sm:$0xff] %vm685_vm0, %v681_v35 }
 0x274   : > { %v1206_v36 = vpop.f32.mrb[14].mxu1  ;;  %708 = sbr.rel (!%p2000_p6) target bundleno = 684 (0x2ac), region = 52 }
 0x275   : > { %v666_v37 = vadd.f32 %v1206_v36, %v1825_v58  ;;  %v660_v38 = vpop.f32.mrb[15].mxu1 }
 0x276   : > { %v661_v39 = vadd.f32 %v660_v38, %v1825_v58 }
 0x277   : > { %v684_v40 = vmax.f32 %v666_v37, 0.0 }
 0x278   : > { %v683_v41 = vmax.f32 %v661_v39, 0.0 }
 0x279   : > { %701 = vst.msk [vmem:[%s1830_s18 + $0x78] sm:$0xff] %vm685_vm0, %v684_v40 }
 0x27a   : > { %700 = vst.msk [vmem:[%s1830_s18 + $0x70] sm:$0xff] %vm685_vm0, %v683_v41 }
 0x27b   : > { %s2011_s6 = smov (!%p711_p7, %s710_s6), 16 }
 0x27c   : > { %s1018_s17 = sshll.u32 %s2011_s6, 7 }
 0x27d   : > { %p1021_p9 = scmp.eq.s32.totalorder %s1018_s17, 0 }
 0x27e   : > { %s1891_s30 = sshrl.u32 (!%p1021_p9), %s2011_s6, 4 }
 0x27f   : > { %719 = sbr.rel (%p1021_p9) target bundleno = 684 (0x2ac), region = 56  ;;  %p1022_p12 = scmp.le.s32.totalorder (!%p1021_p9), %s1891_s30, 0 }
 0x286   : > { %942 = sbr.rel (%p1022_p12) target bundleno = 663 (0x297), region = 138  ;;  %s2001_s4 = smov (!%p1022_p12), %s1885_s16 }
 0x287   : > { %s2002_s20 = smov (!%p1022_p12), %s1830_s18  ;;  %s1900_s23 = smov (!%p1022_p12), 0  }
 0x288   : > { %s1902_s25 = smov (!%p1022_p12), 0  }
 0x28d LB: >> { %v811_v43 = vld [vmem:[%s1517_s20] sm:$0xff]  ;;  %v813_v44 = vld [vmem:[%s1517_s20 + $0x8] sm:$0xff]  ;;  %v815_v45 = vld [vmem:[%s1517_s20 + $0x10] sm:$0xff]  ;;  %s843_s26 = sadd.s32 1, %s1521_s23  ;;  %s805_s25 = sadd.s32 1, %s1525_s25   ;;  %s1525_s25 = sphi %s1902_s25, %s805_s25   ;;  %s1521_s23 = sphi %s1900_s23, %s2003_s23   ;;  %s1517_s20 = sphi %s2002_s20, %s848_s20   ;;  %s1513_s4 = sphi %s2001_s4, %s849_s4  }
 0x28e   : >> { %812 = vst [vmem:[%s1513_s4] sm:$0xff] %v811_v43  ;;  %814 = vst [vmem:[%s1513_s4 + $0x8] sm:$0xff] %v813_v44  ;;  %v817_v46 = vld [vmem:[%s1517_s20 + $0x18] sm:$0xff]  ;;  %v819_v47 = vld [vmem:[%s1517_s20 + $0x20] sm:$0xff]  ;;  %p844_p0 = scmp.ge.s32.totalorder %s843_s26, %s1891_s30  ;;  %p804_p2 = scmp.ge.s32.totalorder %s805_s25, %s1891_s30 }
 0x28f   : >> { %816 = vst [vmem:[%s1513_s4 + $0x10] sm:$0xff] %v815_v45  ;;  %v821_v48 = vld [vmem:[%s1517_s20 + $0x28] sm:$0xff]  ;;  %818 = vst [vmem:[%s1513_s4 + $0x18] sm:$0xff] %v817_v46  ;;  %v823_v49 = vld [vmem:[%s1517_s20 + $0x30] sm:$0xff] }
 0x290   : >> { %820 = vst [vmem:[%s1513_s4 + $0x20] sm:$0xff] %v819_v47  ;;  %822 = vst [vmem:[%s1513_s4 + $0x28] sm:$0xff] %v821_v48  ;;  %v825_v50 = vld [vmem:[%s1517_s20 + $0x38] sm:$0xff]  ;;  %v827_v51 = vld [vmem:[%s1517_s20 + $0x40] sm:$0xff]  ;;  %s2013_s26 = smov (%p844_p0, %s843_s26), 0  ;;  %807 = sbr.rel (!%p804_p2) target bundleno = 653 (0x28d), region = 144 }
 0x291   : >> { %824 = vst [vmem:[%s1513_s4 + $0x30] sm:$0xff] %v823_v49  ;;  %826 = vst [vmem:[%s1513_s4 + $0x38] sm:$0xff] %v825_v50  ;;  %v829_v52 = vld [vmem:[%s1517_s20 + $0x48] sm:$0xff]  ;;  %v831_v53 = vld [vmem:[%s1517_s20 + $0x50] sm:$0xff]  ;;  %s1023_s19 = sshll.u32 %s2013_s26, 7  ;;  %s2003_s23 = smov %s2013_s26 }
 0x292   : >> { %828 = vst [vmem:[%s1513_s4 + $0x40] sm:$0xff] %v827_v51  ;;  %v833_v54 = vld [vmem:[%s1517_s20 + $0x58] sm:$0xff]  ;;  %830 = vst [vmem:[%s1513_s4 + $0x48] sm:$0xff] %v829_v52  ;;  %v835_v55 = vld [vmem:[%s1517_s20 + $0x60] sm:$0xff] }
 0x293   : >> { %832 = vst [vmem:[%s1513_s4 + $0x50] sm:$0xff] %v831_v53  ;;  %834 = vst [vmem:[%s1513_s4 + $0x58] sm:$0xff] %v833_v54  ;;  %v837_v56 = vld [vmem:[%s1517_s20 + $0x68] sm:$0xff]  ;;  %v839_v57 = vld [vmem:[%s1517_s20 + $0x70] sm:$0xff] }
 0x294   : >> { %836 = vst [vmem:[%s1513_s4 + $0x60] sm:$0xff] %v835_v55  ;;  %838 = vst [vmem:[%s1513_s4 + $0x68] sm:$0xff] %v837_v56  ;;  %v841_v58 = vld [vmem:[%s1517_s20 + $0x78] sm:$0xff]  ;;  %s848_s20 = scalar_lea.vmem %s1830_s18, %s1023_s19 [#allocation7]  }
 0x295   : >> { %840 = vst [vmem:[%s1513_s4 + $0x70] sm:$0xff] %v839_v57  ;;  %842 = vst [vmem:[%s1513_s4 + $0x78] sm:$0xff] %v841_v58  ;;  %s849_s4 = scalar_lea.vmem %s1885_s16, %s1023_s19  }
 0x297 PF: > { %s1960_s7 = sand.u32 15, %s2011_s6   ;;  %s1037_s10 = sshll.u32 %s1891_s30, 7 }
 0x298   : > { %s854_s11 = scalar_lea.vmem %s1830_s18, %s1037_s10 [#allocation7]   ;;  %s856_s9 = scalar_lea.vmem %s1885_s16, %s1037_s10  }
 0x299   : > { %p1028_p4 = scmp.le.s32.totalorder %s1960_s7, 0 }
 0x29a   : > { %s1527_s8 = smov (!%p1028_p4), %s856_s9   ;;  %s1531_s28 = smov (!%p1028_p4), %s854_s11  }
 0x29b   : > { %956 = sbr.rel (%p1028_p4) target bundleno = 684 (0x2ac), region = 149  ;;  %s1535_s15 = smov (!%p1028_p4), 0  }
 0x29c   : > { %s1539_s14 = smov (!%p1028_p4), 0  }
 0x2a2 LB: >> { %v866_v59 = vld [vmem:[%s1533_s28] sm:$0xff]  ;;  %s868_s29 = sadd.s32 1, %s1537_s15  ;;  %s860_s14 = sadd.s32 1, %s1541_s14   ;;  %s1541_s14 = sphi %s1539_s14, %s860_s14   ;;  %s1537_s15 = sphi %s1535_s15, %s1536_s15   ;;  %s1533_s28 = sphi %s1531_s28, %s873_s28   ;;  %s1529_s8 = sphi %s1527_s8, %s874_s8  }
 0x2a3   : >> { %867 = vst [vmem:[%s1529_s8] sm:$0xff] %v866_v59  ;;  %p869_p8 = scmp.ge.s32.totalorder %s868_s29, %s1960_s7  ;;  %p859_p10 = scmp.ge.s32.totalorder %s860_s14, %s1960_s7 }
 0x2a5   : >> { %s2015_s29 = smov (%p869_p8, %s868_s29), 0  ;;  %862 = sbr.rel (!%p859_p10) target bundleno = 674 (0x2a2), region = 155 }
 0x2a6   : >> { %s1029_s18 = sshll.u32 %s2015_s29, 3  ;;  %s1536_s15 = smov %s2015_s29  }
 0x2a7   : >> { %s873_s28 = scalar_lea.vmem %s854_s11, %s1029_s18 [#allocation7]   ;;  %s874_s8 = scalar_lea.vmem %s856_s9, %s1029_s18  }
 0x2ac PF: > { %p17_p13 = scmp.ge.s32.totalorder %s1604_s24, 5   ;;  %s2004_s20 = smov %s1501_s21 }
 0x2ad   : > { %s2005_s21 = smov %s1505_s22  ;;  %s2006_s22 = smov %s1614_s27 }
 0x2ae   : > { %s2007_s23 = smov %s1604_s24  ;;  %19 = sbr.rel (!%p17_p13) target bundleno = 6 (0x6), region = 166 }
 0x2b5   :  { %890 = vsyncpa [#allocation4], 1 }
 0x2b6   :  { %892 = vsyncpa [#allocation4 + $0x1], 1 }
 0x2b7   :  { %893 = vsyncpa [#allocation6], 1 }

</bundles_post_ra>
